<compile_context>
chip_gen: v7x
topology: tpu7x:2x2x1
jax: 0.10.0
libtpu: 0.0.40
codegen_flags: <defaults>
</compile_context>

<pallas_src>
import functools

import jax
import jax.numpy as jnp
import numpy as np
from jax.experimental import pallas as pl
from jax.experimental.pallas import tpu as pltpu

THETA = 0.7  # cdcconv default theta in the reference repo


def _process_block_kernel(x_ref, wbc_ref, wb2_ref, wff_ref, b1_ref, b2_ref,
                          bf_ref, out_ref, scr, *, H, W, C, compute_dtype):
    """One batch image per grid step, lane-dense (H, W*C) working layout.

    x_ref  : (1, H, W*C)            image, channels packed along lanes
    wbc_ref: (3, (W+2)*C, 2*W*C)    banded weights: [conv1 | CDC folded through fuse]
    wb2_ref: (3, (W+2)*C, W*C)      banded weights for branch-1 second conv
    wff_ref: (W*C, W*C)             block-diag(wf0): 1x1 fuse for branch 1
    b*_ref : (1, W*C)               lane-tiled biases
    out_ref: (1, H, W*C)
    scr    : (H+2, (W+2)*C) VMEM    zero-padded staging tile (reused for x and h1)
    """
    f32 = jnp.float32
    WC = W * C
    PW = (W + 2) * C

    # Zero only the 1-pixel halo ring; the interior is fully rewritten below.
    scr[0:1, :] = jnp.zeros((1, PW), f32)
    scr[H + 1:H + 2, :] = jnp.zeros((1, PW), f32)
    scr[:, 0:C] = jnp.zeros((H + 2, C), f32)
    scr[:, PW - C:PW] = jnp.zeros((H + 2, C), f32)

    def lrelu(v):
        return jnp.where(v > 0, v, 0.1 * v)

    def band_conv3x3(wb_ref):
        # "SAME" 3x3 conv over the padded scratch as 3 matmuls (one per kernel
        # row): (H, (W+2)*C) x ((W+2)*C, W*Cout) -> lane-dense (H, W*Cout).
        xp = scr[...].astype(compute_dtype)
        acc = jnp.dot(xp[0:H, :], wb_ref[0], preferred_element_type=f32)
        acc = acc + jnp.dot(xp[1:H + 1, :], wb_ref[1], preferred_element_type=f32)
        acc = acc + jnp.dot(xp[2:H + 2, :], wb_ref[2], preferred_element_type=f32)
        return acc

    # Stage padded x; ONE pass gives branch-1's first conv AND the folded
    # (CDC 3x3 + its 1x1 fuse weight) branch.
    scr[1:H + 1, C:C + WC] = x_ref[0]
    comb = band_conv3x3(wbc_ref)                  # (H, 2*W*C)
    h1 = lrelu(comb[:, :WC] + b1_ref[...])        # (H, W*C)
    cdc = comb[:, WC:]                            # (H, W*C), already through fuse

    # Branch-1 second conv: reuse the same padded scratch (halo still zero).
    scr[1:H + 1, C:C + WC] = h1
    h2 = lrelu(band_conv3x3(wb2_ref) + b2_ref[...])

    # Branch-1 1x1 fuse (block-diagonal weight keeps the layout lane-dense),
    # plus the pre-folded CDC contribution and the fuse bias.
    out_ref[0] = (jnp.dot(h2.astype(compute_dtype), wff_ref[...],
                          preferred_element_type=f32)
                  + cdc + bf_ref[...])


def _banded_conv_weight(w_hwio, W):
    """(3, 3, Cin, Cout) HWIO -> (3, (W+2)*Cin, W*Cout) banded matmul weights.

    WB[dy][(w+dx)*Cin + i, w*Cout + o] == w_hwio[dy, dx, i, o]  (zeros elsewhere),
    so (padded-row strips) @ WB[dy], summed over dy, equals the SAME 3x3 conv
    with the output laid out lane-dense as (H, W*Cout).
    """
    rows = []
    for dy in range(3):
        blk = 0.0
        for dx in range(3):
            shift = jnp.eye(W + 2, W, k=-dx, dtype=w_hwio.dtype)   # (W+2, W)
            blk = blk + jnp.kron(shift, w_hwio[dy, dx])            # ((W+2)Cin, W*Cout)
        rows.append(blk)
    return jnp.stack(rows, axis=0)


def process_block_pallas(x_nhwc, params, use_bf16=False):
    """x_nhwc: (N, H, W, C) float32.  Returns (N, H, W, C)."""
    N, H, W, C = x_nhwc.shape
    w1, b1, w2, b2, wc, wf, bf = params
    WC, PW = W * C, (W + 2) * C
    compute_dtype = jnp.bfloat16 if use_bf16 else jnp.float32

    # ---- host-side (grid-invariant) weight algebra, done once ----
    # CDC == a single 3x3 conv whose center tap is shifted by -theta*sum(wc).
    kdiff = jnp.sum(wc, axis=(0, 1))                          # (C, C)
    wc_eff = wc.at[1, 1].add(-THETA * kdiff)
    # Fold the CDC half of the 1x1 fuse weight into that 3x3 kernel.
    wc_fused = jnp.einsum('hwio,op->hwip', wc_eff, wf[1])
    # Banded (lane-packed) weights; conv1 and folded-CDC share one input pass.
    wb_comb = jnp.concatenate(
        [_banded_conv_weight(w1, W), _banded_conv_weight(wc_fused, W)], axis=-1)
    wb2 = _banded_conv_weight(w2, W)                          # (3, PW, WC)
    wff = jnp.kron(jnp.eye(W, dtype=wf.dtype), wf[0])         # (WC, WC)
    b1_t = jnp.tile(b1.reshape(-1), W).reshape(1, WC)
    b2_t = jnp.tile(b2.reshape(-1), W).reshape(1, WC)
    bf_t = jnp.tile(bf.reshape(-1), W).reshape(1, WC)
    wb_comb = wb_comb.astype(compute_dtype)
    wb2 = wb2.astype(compute_dtype)
    wff = wff.astype(compute_dtype)

    # Lane-dense working layout; free row-major reshape, no host-side padding.
    x2d = x_nhwc.reshape(N, H, WC)

    kernel = functools.partial(_process_block_kernel, H=H, W=W, C=C,
                               compute_dtype=compute_dtype)

    def wfull(a):
        nd = a.ndim
        return pl.BlockSpec(a.shape, lambda n: (0,) * nd)

    flops = 2 * N * H * (3 * PW * 2 * WC + 3 * PW * WC + WC * WC)
    weight_bytes = int((wb_comb.size + wb2.size + wff.size) * wb_comb.dtype.itemsize
                       + (b1_t.size + b2_t.size + bf_t.size) * 4)
    bytes_accessed = int(4 * 2 * N * H * WC) + weight_bytes

    out2d = pl.pallas_call(
        kernel,
        out_shape=jax.ShapeDtypeStruct((N, H, WC), jnp.float32),
        grid=(N,),
        in_specs=[
            pl.BlockSpec((1, H, WC), lambda n: (n, 0, 0)),
            wfull(wb_comb), wfull(wb2), wfull(wff),
            wfull(b1_t), wfull(b2_t), wfull(bf_t),
        ],
        out_specs=pl.BlockSpec((1, H, WC), lambda n: (n, 0, 0)),
        scratch_shapes=[pltpu.VMEM((H + 2, PW), jnp.float32)],
        compiler_params=pltpu.CompilerParams(
            dimension_semantics=("parallel",)),
        cost_estimate=pl.CostEstimate(flops=flops, transcendentals=0,
                                      bytes_accessed=bytes_accessed),
    )(x2d, wb_comb, wb2, wff, b1_t, b2_t, bf_t)
    return out2d.reshape(N, H, W, C)


def process_block_ref(x_nhwc, params):
    """Pure-JAX reference (mirrors the PyTorch forward, NHWC/HWIO)."""
    w1, b1, w2, b2, wc, wf, bf = params

    def conv(x, w, pad):
        return jax.lax.conv_general_dilated(
            x, w, (1, 1), pad, dimension_numbers=('NHWC', 'HWIO', 'NHWC'))

    def lrelu(v):
        return jnp.where(v > 0, v, 0.1 * v)

    h1 = lrelu(conv(x_nhwc, w1, 'SAME') + b1[0])
    h2 = lrelu(conv(h1, w2, 'SAME') + b2[0])

    out_normal = conv(x_nhwc, wc, 'SAME')
    kdiff = jnp.sum(wc, axis=(0, 1))[None, None]                   # (1,1,C,C)
    out_diff = conv(x_nhwc, kdiff, 'VALID')
    hcdc = out_normal - THETA * out_diff

    wf_full = jnp.concatenate([wf[0], wf[1]], axis=0)[None, None]  # (1,1,2C,C)
    cat = jnp.concatenate([h2, hcdc], axis=-1)
    return conv(cat, wf_full, 'VALID') + bf[0]


def make_params(key, C):
    ks = jax.random.split(key, 7)
    scale = 0.1
    w1 = scale * jax.random.normal(ks[0], (3, 3, C, C), jnp.float32)
    b1 = scale * jax.random.normal(ks[1], (1, C), jnp.float32)
    w2 = scale * jax.random.normal(ks[2], (3, 3, C, C), jnp.float32)
    b2 = scale * jax.random.normal(ks[3], (1, C), jnp.float32)
    wc = scale * jax.random.normal(ks[4], (3, 3, C, C), jnp.float32)  # cdc conv, bias=False
    wf = scale * jax.random.normal(ks[5], (2, C, C), jnp.float32)     # 1x1 fuse, split per branch
    bf = scale * jax.random.normal(ks[6], (1, C), jnp.float32)
    return (w1, b1, w2, b2, wc, wf, bf)


if __name__ == "__main__":
    N, C, H, W = 2, 4, 16, 16
    key = jax.random.PRNGKey(0)
    kx, kp = jax.random.split(key)
    # PyTorch input would be NCHW (2,4,16,16); we work in NHWC.
    x_nchw = jax.random.normal(kx, (N, C, H, W), jnp.float32)
    x_nhwc = jnp.transpose(x_nchw, (0, 2, 3, 1))
    params = make_params(kp, C)

    out = process_block_pallas(x_nhwc, params)
    out = jax.block_until_ready(out)

    ref = process_block_ref(x_nhwc, params)
    np.testing.assert_allclose(np.asarray(out), np.asarray(ref),
                               rtol=1e-4, atol=1e-4)
    print("KERNEL_OK")
</pallas_src>

<mosaic_0001>
module attributes {stable_mosaic.version = 11 : i64} {
  func.func @_process_block_kernel(%arg0: i32, %arg1: memref<1x16x64xf32, #tpu.memory_space<vmem>>, %arg2: memref<3x72x128xf32, #tpu.memory_space<vmem>>, %arg3: memref<3x72x64xf32, #tpu.memory_space<vmem>>, %arg4: memref<64x64xf32, #tpu.memory_space<vmem>>, %arg5: memref<1x64xf32, #tpu.memory_space<vmem>>, %arg6: memref<1x64xf32, #tpu.memory_space<vmem>>, %arg7: memref<1x64xf32, #tpu.memory_space<vmem>>, %arg8: memref<1x16x64xf32, #tpu.memory_space<vmem>>, %arg9: memref<18x72xf32, #tpu.memory_space<vmem>>) attributes {dimension_semantics = [#tpu.dimension_semantics<parallel>], iteration_bounds = array<i64: 2>, scalar_prefetch = 0 : i64, scratch_operands = 1 : i64, tpu.core_type = #tpu.core_type<tc>, window_params = [{transform_indices = @transform_0, window_bounds = array<i64: 1, 16, 64>}, {pipeline_mode = #tpu.pipeline_mode<synchronous>, transform_indices = @transform_1, window_bounds = array<i64: 3, 72, 128>}, {pipeline_mode = #tpu.pipeline_mode<synchronous>, transform_indices = @transform_2, window_bounds = array<i64: 3, 72, 64>}, {pipeline_mode = #tpu.pipeline_mode<synchronous>, transform_indices = @transform_3, window_bounds = array<i64: 64, 64>}, {pipeline_mode = #tpu.pipeline_mode<synchronous>, transform_indices = @transform_4, window_bounds = array<i64: 1, 64>}, {pipeline_mode = #tpu.pipeline_mode<synchronous>, transform_indices = @transform_5, window_bounds = array<i64: 1, 64>}, {pipeline_mode = #tpu.pipeline_mode<synchronous>, transform_indices = @transform_6, window_bounds = array<i64: 1, 64>}, {transform_indices = @transform_7, window_bounds = array<i64: 1, 16, 64>}]} {
    %cst = arith.constant 0.000000e+00 : f32
    %0 = vector.broadcast %cst : f32 to vector<1x72xf32>
    %c0 = arith.constant 0 : index
    %c0_0 = arith.constant 0 : index
    %1 = vector.load %arg9[%c0, %c0_0] : memref<18x72xf32, #tpu.memory_space<vmem>>, vector<1x72xf32>
    tpu.vector_store %arg9[%c0, %c0_0], %0 {strides = array<i32>} : memref<18x72xf32, #tpu.memory_space<vmem>>, vector<1x72xf32>,
    %cst_1 = arith.constant 0.000000e+00 : f32
    %2 = vector.broadcast %cst_1 : f32 to vector<1x72xf32>
    %c17 = arith.constant 17 : index
    %c0_2 = arith.constant 0 : index
    %3 = vector.load %arg9[%c17, %c0_2] : memref<18x72xf32, #tpu.memory_space<vmem>>, vector<1x72xf32>
    tpu.vector_store %arg9[%c17, %c0_2], %2 {strides = array<i32>} : memref<18x72xf32, #tpu.memory_space<vmem>>, vector<1x72xf32>,
    %cst_3 = arith.constant 0.000000e+00 : f32
    %4 = vector.broadcast %cst_3 : f32 to vector<18x4xf32>
    %c0_4 = arith.constant 0 : index
    %c0_5 = arith.constant 0 : index
    %5 = vector.load %arg9[%c0_4, %c0_5] : memref<18x72xf32, #tpu.memory_space<vmem>>, vector<18x4xf32>
    tpu.vector_store %arg9[%c0_4, %c0_5], %4 {strides = array<i32>} : memref<18x72xf32, #tpu.memory_space<vmem>>, vector<18x4xf32>,
    %cst_6 = arith.constant 0.000000e+00 : f32
    %6 = vector.broadcast %cst_6 : f32 to vector<18x4xf32>
    %c0_7 = arith.constant 0 : index
    %c68 = arith.constant 68 : index
    %7 = vector.load %arg9[%c0_7, %c68] : memref<18x72xf32, #tpu.memory_space<vmem>>, vector<18x4xf32>
    tpu.vector_store %arg9[%c0_7, %c68], %6 {strides = array<i32>} : memref<18x72xf32, #tpu.memory_space<vmem>>, vector<18x4xf32>,
    %c0_8 = arith.constant 0 : index
    %c0_9 = arith.constant 0 : index
    %c0_10 = arith.constant 0 : index
    %8 = vector.load %arg1[%c0_8, %c0_9, %c0_10] : memref<1x16x64xf32, #tpu.memory_space<vmem>>, vector<1x16x64xf32>
    %9 = vector.shape_cast %8 : vector<1x16x64xf32> to vector<16x64xf32>
    %c1 = arith.constant 1 : index
    %c4 = arith.constant 4 : index
    %10 = vector.load %arg9[%c1, %c4] : memref<18x72xf32, #tpu.memory_space<vmem>>, vector<16x64xf32>
    tpu.vector_store %arg9[%c1, %c4], %9 {strides = array<i32>} : memref<18x72xf32, #tpu.memory_space<vmem>>, vector<16x64xf32>,
    %c0_11 = arith.constant 0 : index
    %c0_12 = arith.constant 0 : index
    %11 = vector.load %arg9[%c0_11, %c0_12] : memref<18x72xf32, #tpu.memory_space<vmem>>, vector<18x72xf32>
    %12 = vector.extract_strided_slice %11 {offsets = [0, 0], sizes = [16, 72], strides = [1, 1]} : vector<18x72xf32> to vector<16x72xf32>
    %c0_13 = arith.constant 0 : index
    %c0_14 = arith.constant 0 : index
    %c0_15 = arith.constant 0 : index
    %13 = vector.load %arg2[%c0_13, %c0_14, %c0_15] : memref<3x72x128xf32, #tpu.memory_space<vmem>>, vector<1x72x128xf32>
    %14 = vector.shape_cast %13 : vector<1x72x128xf32> to vector<72x128xf32>
    %cst_16 = arith.constant dense<0.000000e+00> : vector<16x128xf32>
    %15 = tpu.matmul %12, %14, %cst_16 {dimension_numbers = #tpu.dot_dimension_numbers<[1], [0], [0], [1], [0, 0, 1, 1], [], []>} : vector<16x72xf32>, vector<72x128xf32>, vector<16x128xf32> -> vector<16x128xf32>
    %16 = vector.extract_strided_slice %11 {offsets = [1, 0], sizes = [16, 72], strides = [1, 1]} : vector<18x72xf32> to vector<16x72xf32>
    %c1_17 = arith.constant 1 : index
    %c0_18 = arith.constant 0 : index
    %c0_19 = arith.constant 0 : index
    %17 = vector.load %arg2[%c1_17, %c0_18, %c0_19] : memref<3x72x128xf32, #tpu.memory_space<vmem>>, vector<1x72x128xf32>
    %18 = vector.shape_cast %17 : vector<1x72x128xf32> to vector<72x128xf32>
    %cst_20 = arith.constant dense<0.000000e+00> : vector<16x128xf32>
    %19 = tpu.matmul %16, %18, %cst_20 {dimension_numbers = #tpu.dot_dimension_numbers<[1], [0], [0], [1], [0, 0, 1, 1], [], []>} : vector<16x72xf32>, vector<72x128xf32>, vector<16x128xf32> -> vector<16x128xf32>
    %20 = arith.addf %15, %19 : vector<16x128xf32>
    %21 = vector.extract_strided_slice %11 {offsets = [2, 0], sizes = [16, 72], strides = [1, 1]} : vector<18x72xf32> to vector<16x72xf32>
    %c2 = arith.constant 2 : index
    %c0_21 = arith.constant 0 : index
    %c0_22 = arith.constant 0 : index
    %22 = vector.load %arg2[%c2, %c0_21, %c0_22] : memref<3x72x128xf32, #tpu.memory_space<vmem>>, vector<1x72x128xf32>
    %23 = vector.shape_cast %22 : vector<1x72x128xf32> to vector<72x128xf32>
    %cst_23 = arith.constant dense<0.000000e+00> : vector<16x128xf32>
    %24 = tpu.matmul %21, %23, %cst_23 {dimension_numbers = #tpu.dot_dimension_numbers<[1], [0], [0], [1], [0, 0, 1, 1], [], []>} : vector<16x72xf32>, vector<72x128xf32>, vector<16x128xf32> -> vector<16x128xf32>
    %25 = arith.addf %20, %24 : vector<16x128xf32>
    %26 = vector.extract_strided_slice %25 {offsets = [0, 0], sizes = [16, 64], strides = [1, 1]} : vector<16x128xf32> to vector<16x64xf32>
    %c0_24 = arith.constant 0 : index
    %c0_25 = arith.constant 0 : index
    %27 = vector.load %arg5[%c0_24, %c0_25] : memref<1x64xf32, #tpu.memory_space<vmem>>, vector<1x64xf32>
    %28 = vector.broadcast %27 : vector<1x64xf32> to vector<16x64xf32>
    %29 = arith.addf %26, %28 : vector<16x64xf32>
    %cst_26 = arith.constant 0.000000e+00 : f32
    %30 = vector.broadcast %cst_26 : f32 to vector<16x64xf32>
    %31 = arith.cmpf ogt, %29, %30 : vector<16x64xf32>
    %cst_27 = arith.constant 1.000000e-01 : f32
    %32 = vector.broadcast %cst_27 : f32 to vector<16x64xf32>
    %33 = arith.mulf %32, %29 : vector<16x64xf32>
    %34 = arith.select %31, %29, %33 : vector<16x64xi1>, vector<16x64xf32>
    %35 = vector.extract_strided_slice %25 {offsets = [0, 64], sizes = [16, 64], strides = [1, 1]} : vector<16x128xf32> to vector<16x64xf32>
    %c1_28 = arith.constant 1 : index
    %c4_29 = arith.constant 4 : index
    %36 = vector.load %arg9[%c1_28, %c4_29] : memref<18x72xf32, #tpu.memory_space<vmem>>, vector<16x64xf32>
    tpu.vector_store %arg9[%c1_28, %c4_29], %34 {strides = array<i32>} : memref<18x72xf32, #tpu.memory_space<vmem>>, vector<16x64xf32>,
    %c0_30 = arith.constant 0 : index
    %c0_31 = arith.constant 0 : index
    %37 = vector.load %arg9[%c0_30, %c0_31] : memref<18x72xf32, #tpu.memory_space<vmem>>, vector<18x72xf32>
    %38 = vector.extract_strided_slice %37 {offsets = [0, 0], sizes = [16, 72], strides = [1, 1]} : vector<18x72xf32> to vector<16x72xf32>
    %c0_32 = arith.constant 0 : index
    %c0_33 = arith.constant 0 : index
    %c0_34 = arith.constant 0 : index
    %39 = vector.load %arg3[%c0_32, %c0_33, %c0_34] : memref<3x72x64xf32, #tpu.memory_space<vmem>>, vector<1x72x64xf32>
    %40 = vector.shape_cast %39 : vector<1x72x64xf32> to vector<72x64xf32>
    %cst_35 = arith.constant dense<0.000000e+00> : vector<16x64xf32>
    %41 = tpu.matmul %38, %40, %cst_35 {dimension_numbers = #tpu.dot_dimension_numbers<[1], [0], [0], [1], [0, 0, 1, 1], [], []>} : vector<16x72xf32>, vector<72x64xf32>, vector<16x64xf32> -> vector<16x64xf32>
    %42 = vector.extract_strided_slice %37 {offsets = [1, 0], sizes = [16, 72], strides = [1, 1]} : vector<18x72xf32> to vector<16x72xf32>
    %c1_36 = arith.constant 1 : index
    %c0_37 = arith.constant 0 : index
    %c0_38 = arith.constant 0 : index
    %43 = vector.load %arg3[%c1_36, %c0_37, %c0_38] : memref<3x72x64xf32, #tpu.memory_space<vmem>>, vector<1x72x64xf32>
    %44 = vector.shape_cast %43 : vector<1x72x64xf32> to vector<72x64xf32>
    %cst_39 = arith.constant dense<0.000000e+00> : vector<16x64xf32>
    %45 = tpu.matmul %42, %44, %cst_39 {dimension_numbers = #tpu.dot_dimension_numbers<[1], [0], [0], [1], [0, 0, 1, 1], [], []>} : vector<16x72xf32>, vector<72x64xf32>, vector<16x64xf32> -> vector<16x64xf32>
    %46 = arith.addf %41, %45 : vector<16x64xf32>
    %47 = vector.extract_strided_slice %37 {offsets = [2, 0], sizes = [16, 72], strides = [1, 1]} : vector<18x72xf32> to vector<16x72xf32>
    %c2_40 = arith.constant 2 : index
    %c0_41 = arith.constant 0 : index
    %c0_42 = arith.constant 0 : index
    %48 = vector.load %arg3[%c2_40, %c0_41, %c0_42] : memref<3x72x64xf32, #tpu.memory_space<vmem>>, vector<1x72x64xf32>
    %49 = vector.shape_cast %48 : vector<1x72x64xf32> to vector<72x64xf32>
    %cst_43 = arith.constant dense<0.000000e+00> : vector<16x64xf32>
    %50 = tpu.matmul %47, %49, %cst_43 {dimension_numbers = #tpu.dot_dimension_numbers<[1], [0], [0], [1], [0, 0, 1, 1], [], []>} : vector<16x72xf32>, vector<72x64xf32>, vector<16x64xf32> -> vector<16x64xf32>
    %51 = arith.addf %46, %50 : vector<16x64xf32>
    %c0_44 = arith.constant 0 : index
    %c0_45 = arith.constant 0 : index
    %52 = vector.load %arg6[%c0_44, %c0_45] : memref<1x64xf32, #tpu.memory_space<vmem>>, vector<1x64xf32>
    %53 = vector.broadcast %52 : vector<1x64xf32> to vector<16x64xf32>
    %54 = arith.addf %51, %53 : vector<16x64xf32>
    %cst_46 = arith.constant 0.000000e+00 : f32
    %55 = vector.broadcast %cst_46 : f32 to vector<16x64xf32>
    %56 = arith.cmpf ogt, %54, %55 : vector<16x64xf32>
    %cst_47 = arith.constant 1.000000e-01 : f32
    %57 = vector.broadcast %cst_47 : f32 to vector<16x64xf32>
    %58 = arith.mulf %57, %54 : vector<16x64xf32>
    %59 = arith.select %56, %54, %58 : vector<16x64xi1>, vector<16x64xf32>
    %c0_48 = arith.constant 0 : index
    %c0_49 = arith.constant 0 : index
    %60 = vector.load %arg4[%c0_48, %c0_49] : memref<64x64xf32, #tpu.memory_space<vmem>>, vector<64x64xf32>
    %cst_50 = arith.constant dense<0.000000e+00> : vector<16x64xf32>
    %61 = tpu.matmul %59, %60, %cst_50 {dimension_numbers = #tpu.dot_dimension_numbers<[1], [0], [0], [1], [0, 0, 1, 1], [], []>} : vector<16x64xf32>, vector<64x64xf32>, vector<16x64xf32> -> vector<16x64xf32>
    %62 = arith.addf %61, %35 : vector<16x64xf32>
    %c0_51 = arith.constant 0 : index
    %c0_52 = arith.constant 0 : index
    %63 = vector.load %arg7[%c0_51, %c0_52] : memref<1x64xf32, #tpu.memory_space<vmem>>, vector<1x64xf32>
    %64 = vector.broadcast %63 : vector<1x64xf32> to vector<16x64xf32>
    %65 = arith.addf %62, %64 : vector<16x64xf32>
    %c0_53 = arith.constant 0 : index
    %c0_54 = arith.constant 0 : index
    %c0_55 = arith.constant 0 : index
    %66 = vector.load %arg8[%c0_53, %c0_54, %c0_55] : memref<1x16x64xf32, #tpu.memory_space<vmem>>, vector<1x16x64xf32>
    %67 = vector.shape_cast %66 : vector<1x16x64xf32> to vector<16x64xf32>
    %68 = vector.shape_cast %65 : vector<16x64xf32> to vector<1x16x64xf32>
    tpu.vector_store %arg8[%c0_53, %c0_54, %c0_55], %68 {strides = array<i32>} : memref<1x16x64xf32, #tpu.memory_space<vmem>>, vector<1x16x64xf32>,
    return
  }
  func.func @transform_0(%arg0: i32) -> (i32, i32, i32) {
    %c0_i32 = arith.constant 0 : i32
    %c0_i32_0 = arith.constant 0 : i32
    %c0_i32_1 = arith.constant 0 : i32
    return %arg0, %c0_i32, %c0_i32_0 : i32, i32, i32
  }
  func.func @transform_1(%arg0: i32) -> (i32, i32, i32) {
    %c0_i32 = arith.constant 0 : i32
    %c0_i32_0 = arith.constant 0 : i32
    %c0_i32_1 = arith.constant 0 : i32
    %c0_i32_2 = arith.constant 0 : i32
    return %c0_i32, %c0_i32_0, %c0_i32_1 : i32, i32, i32
  }
  func.func @transform_2(%arg0: i32) -> (i32, i32, i32) {
    %c0_i32 = arith.constant 0 : i32
    %c0_i32_0 = arith.constant 0 : i32
    %c0_i32_1 = arith.constant 0 : i32
    %c0_i32_2 = arith.constant 0 : i32
    return %c0_i32, %c0_i32_0, %c0_i32_1 : i32, i32, i32
  }
  func.func @transform_3(%arg0: i32) -> (i32, i32) {
    %c0_i32 = arith.constant 0 : i32
    %c0_i32_0 = arith.constant 0 : i32
    %c0_i32_1 = arith.constant 0 : i32
    return %c0_i32, %c0_i32_0 : i32, i32
  }
  func.func @transform_4(%arg0: i32) -> (i32, i32) {
    %c0_i32 = arith.constant 0 : i32
    %c0_i32_0 = arith.constant 0 : i32
    %c0_i32_1 = arith.constant 0 : i32
    return %c0_i32, %c0_i32_0 : i32, i32
  }
  func.func @transform_5(%arg0: i32) -> (i32, i32) {
    %c0_i32 = arith.constant 0 : i32
    %c0_i32_0 = arith.constant 0 : i32
    %c0_i32_1 = arith.constant 0 : i32
    return %c0_i32, %c0_i32_0 : i32, i32
  }
  func.func @transform_6(%arg0: i32) -> (i32, i32) {
    %c0_i32 = arith.constant 0 : i32
    %c0_i32_0 = arith.constant 0 : i32
    %c0_i32_1 = arith.constant 0 : i32
    return %c0_i32, %c0_i32_0 : i32, i32
  }
  func.func @transform_7(%arg0: i32) -> (i32, i32, i32) {
    %c0_i32 = arith.constant 0 : i32
    %c0_i32_0 = arith.constant 0 : i32
    %c0_i32_1 = arith.constant 0 : i32
    return %arg0, %c0_i32, %c0_i32_0 : i32, i32, i32
  }
}

</mosaic_0001>

<bundles_post_ra>
// kernel: tpu_custom_call.1
= control target key start
LH: loop header
LB: loop body
LE: loop exit
PB: predicated region body
PF: predicated region fallthrough
CT: control target
= control target key end

     0   :  { %12 = vsyncpa [#allocation4], 0  ;;  %s1991_s0 = inlined_call_operand.vmem [shape: f32[2,16,64], index: 0, kind: input, shape index: {}]   ;;  %s1992_s1 = inlined_call_operand.vmem [shape: f32[3,72,128], index: 1, kind: input, shape index: {}]   ;;  %s1993_s2 = inlined_call_operand.vmem [shape: f32[3,72,64], index: 2, kind: input, shape index: {}]   ;;  %s1994_s3 = inlined_call_operand.vmem [shape: f32[64,64], index: 3, kind: input, shape index: {}]   ;;  %s1995_s4 = inlined_call_operand.vmem [shape: f32[1,64], index: 4, kind: input, shape index: {}]   ;;  %s1996_s5 = inlined_call_operand.vmem [shape: f32[1,64], index: 5, kind: input, shape index: {}]   ;;  %s1997_s6 = inlined_call_operand.vmem [shape: f32[1,64], index: 6, kind: input, shape index: {}]   ;;  %s1998_s7 = inlined_call_operand.hbm [shape: f32[2,16,64], index: 7, kind: output, shape index: {}]  }
   0x1   :  { %14 = vsyncpa [#allocation4 + $0x1], 0  ;;  %s1661_s24 = smov 0   ;;  %s1663_s25 = smov 0  }
   0x2   :  { %s1665_s26 = smov 0   ;;  %s1667_s27 = smov 0  }
   0x3 LB: > { %s1682_s28 = sadd.s32 4294967295, %s1613_s27   ;;  %s1099_s29 = sadd.s32 4294967294, %s1613_s27   ;;  %s1613_s27 = sphi %s1667_s27, %s2004_s27   ;;  %s1609_s26 = sphi %s1665_s26, %s2003_s26   ;;  %s1605_s25 = sphi %s1663_s25, %s2002_s25   ;;  %s1601_s24 = sphi %s1661_s24, %s2001_s24  }
   0x4   : > { %s1686_s30 = sadd.s32 1, %s1613_s27   ;;  %s179_s8 = sadd.s32 1, %s1609_s26 }
   0x5   : > { %s176_s9 = ssub.s32 %s1613_s27, %s1686_s30  ;;  %p189_p0 = scmp.ne.s32.totalorder %s1609_s26, %s1605_s25 }
   0x6   : > { %p177_p1 = scmp.eq.s32.totalorder %s176_s9, 0  ;;  %p190_p2 = scmp.eq.s32.totalorder %s1682_s28, 1 }
   0x7   : > { %p195_p3 = scmp.ne.s32.totalorder %s1605_s25, %s1601_s24  ;;  %p196_p4 = scmp.eq.s32.totalorder %s1099_s29, 1 }
   0x8   : > { %s1697_s10 = scalar_select %p177_p1, %s1609_s26, %s179_s8  }
   0x9   : > { %p1699_p5 = por %p190_p2, %p189_p0  ;;  %p1703_p6 = por %p196_p4, %p195_p3 }
   0xa   : > { %p1102_p7 = scmp.ge.s32.totalorder %s1613_s27, 1  ;;  %p240_p8 = scmp.lt.s32.totalorder %s1613_s27, 3 }
   0xc   : > { %p241_p9 = pnand %p1102_p7, %p240_p8 }
   0xd   : > { %p272_p10 = scmp.lt.s32.totalorder (!%p241_p9), %s1682_s28, 1  ;;  %v1106_v0 = vld [vmem:[%s1992_s1 + $0x48] sm:$0xff] (!%p241_p9)  ;;  %v1107_v1 = vld [vmem:[%s1992_s1 + $0x50] sm:$0xff] (!%p241_p9)  ;;  %vm277_vm0 = vcmask (!%p241_p9), 581632   ;;  %v1615_v3 = vmov (!%p241_p9), 0.0   ;;  %vm280_vm1 = vcmask (!%p241_p9), 31744  }
   0xe   : > { %244 = sbr.rel (%p241_p9) target bundleno = 1029 (0x405), region = 48  ;;  %v1387_v2 = vpack.c.bf16 (!%p241_p9), %v1107_v1, %v1106_v0  ;;  %278 = vst.msk [vmem:[#allocation2] sm:$0x1] (!%p241_p9), %vm277_vm0, %v1615_v3  ;;  %vm285_vm2 = vcmask (!%p241_p9), 589344   ;;  %279 = vst.msk [vmem:[#allocation2 + $0x11] sm:$0x1] (!%p241_p9), %vm277_vm0, %v1615_v3 }
   0xf   : > { %v1108_v4 = vld [vmem:[%s1992_s1 + $0x58] sm:$0xff] (!%p241_p9)  ;;  %v1109_v5 = vld [vmem:[%s1992_s1 + $0x60] sm:$0xff] (!%p241_p9)  ;;  %281 = vst.msk [vmem:[#allocation2] sm:$0xff] (!%p241_p9), %vm280_vm1, %v1615_v3  ;;  %282 = vst.msk [vmem:[#allocation2 + $0x8] sm:$0xff] (!%p241_p9), %vm280_vm1, %v1615_v3  ;;  %vm283_vm3 = vcmask (!%p241_p9), 25600   ;;  %vm288_vm4 = vcmask (!%p241_p9), 583200  }
  0x10   : > { %v1391_v6 = vpack.c.bf16 (!%p241_p9), %v1109_v5, %v1108_v4  ;;  %v1110_v7 = vld [vmem:[%s1992_s1 + $0x68] sm:$0xff] (!%p241_p9)  ;;  %v1111_v8 = vld [vmem:[%s1992_s1 + $0x70] sm:$0xff] (!%p241_p9)  ;;  %1388 = vmatprep.subr.bf16.mxu0 (!%p241_p9), %v1387_v2  ;;  %286 = vst.msk [vmem:[#allocation2] sm:$0xff] (!%p241_p9), %vm285_vm2, %v1615_v3  ;;  %287 = vst.msk [vmem:[#allocation2 + $0x8] sm:$0xff] (!%p241_p9), %vm285_vm2, %v1615_v3  ;;  %s1616_s20 = smov (!%p241_p9), 4   ;;  %vm300_vm5 = vcmask (!%p241_p9), 556064  }
  0x11   : > { %284 = vst.msk [vmem:[#allocation2 + $0x10] sm:$0x3] (!%p241_p9), %vm283_vm3, %v1615_v3  ;;  %1390 = vmatpush3.bf16.msra.mxu0 (!%p241_p9), %v1387_v2  ;;  %v1395_v9 = vpack.c.bf16 (!%p241_p9), %v1111_v8, %v1110_v7  ;;  %v1112_v11 = vld [vmem:[%s1992_s1 + $0x78] sm:$0xff] (!%p241_p9)  ;;  %v1113_v12 = vld [vmem:[%s1992_s1 + $0x80] sm:$0xff] (!%p241_p9)  ;;  %v1114_v15 = vld [vmem:[%s1992_s1 + $0x88] sm:$0xff] (!%p241_p9)  ;;  %vm328_vm6 = vcmask (!%p241_p9), 1046528  }
  0x12   : > { %289 = vst.msk [vmem:[#allocation2 + $0x10] sm:$0x3] (!%p241_p9), %vm288_vm4, %v1615_v3  ;;  %1392 = vmatprep.subr.bf16.mxu0 (!%p241_p9), %v1391_v6  ;;  %v1399_v14 = vpack.c.bf16 (!%p241_p9), %v1113_v12, %v1112_v11  ;;  %v306_v16 = vld [vmem:[%s1992_s1] sm:$0xff] (!%p241_p9)  ;;  %v307_v17 = vld [vmem:[%s1992_s1 + $0x8] sm:$0xff] (!%p241_p9)  ;;  %v308_v22 = vld [vmem:[%s1992_s1 + $0x10] sm:$0xff] (!%p241_p9)  ;;  %vm334_vm7 = vcmask (!%p241_p9), 588800  }
  0x13   : > { %v1403_v18 = vpack.c.bf16 (!%p241_p9), %v307_v17, %v306_v16  ;;  %v309_v25 = vld [vmem:[%s1992_s1 + $0x18] sm:$0xff] (!%p241_p9)  ;;  %v310_v32 = vld [vmem:[%s1992_s1 + $0x20] sm:$0xff] (!%p241_p9)  ;;  %v311_v33 = vld [vmem:[%s1992_s1 + $0x28] sm:$0xff] (!%p241_p9)  ;;  %vm503_vm8 = vcmask (!%p241_p9), 1045504   ;;  %s1617_s8 = smov (!%p241_p9), 64   ;;  %vm930_vm13 = vcmask (!%p241_p9), 523264  }
  0x14   : > { %v1407_v31 = vpack.c.bf16 (!%p241_p9), %v309_v25, %v308_v22  ;;  %v1411_v34 = vpack.c.bf16 (!%p241_p9), %v311_v33, %v310_v32  ;;  %v312_v35 = vld [vmem:[%s1992_s1 + $0x30] sm:$0xff] (!%p241_p9)  ;;  %v313_v36 = vld [vmem:[%s1992_s1 + $0x38] sm:$0xff] (!%p241_p9)  ;;  %v314_v38 = vld [vmem:[%s1992_s1 + $0x40] sm:$0xff] (!%p241_p9)  ;;  %s1165_s18 = sshll.u32 (!%p241_p9), %s1682_s28, 8  ;;  %s1618_s29 = smov (!%p241_p9), [#allocation3]  }
  0x15   : > { %s273_s21 = scalar_select %p272_p10, %s1682_s28, 1  ;;  %1394 = vmatpush3.bf16.msra.mxu0 %v1391_v6  ;;  %v1415_v37 = vpack.c.bf16 %v313_v36, %v312_v35  ;;  %v1119_v39 = vld [vmem:[%s1992_s1 + $0x90] sm:$0xff]  ;;  %v1120_v40 = vld [vmem:[%s1992_s1 + $0x98] sm:$0xff]  ;;  %v1121_v41 = vld [vmem:[%s1992_s1 + $0xa0] sm:$0xff] }
  0x16   : > { %1396 = vmatprep.subr.bf16.mxu0 %v1395_v9  ;;  %v1122_v42 = vld [vmem:[%s1992_s1 + $0xa8] sm:$0xff]  ;;  %v1419_v43 = vpack.c.bf16 %v1120_v40, %v1119_v39  ;;  %v1123_v47 = vld [vmem:[%s1992_s1 + $0xb0] sm:$0xff]  ;;  %v1124_v48 = vld [vmem:[%s1992_s1 + $0xb8] sm:$0xff]  ;;  %s1944_s22 = scalar_lea.hbm %s1998_s7, %s1165_s18 }
  0x17   : > { %s1164_s9 = sshll.u32 %s273_s21, 4  ;;  %v1423_v46 = vpack.c.bf16 %v1122_v42, %v1121_v41  ;;  %v1427_v50 = vpack.c.bf16 %v1124_v48, %v1123_v47  ;;  %v1125_v51 = vld [vmem:[%s1992_s1 + $0xc0] sm:$0xff]  ;;  %v1126_v52 = vld [vmem:[%s1992_s1 + $0xc8] sm:$0xff]  ;;  %v1127_v54 = vld [vmem:[%s1992_s1 + $0xd0] sm:$0xff] }
  0x18   : > { %s276_s15 = scalar_lea.vmem %s1991_s0, %s1164_s9  ;;  %v1431_v53 = vpack.c.bf16 %v1126_v52, %v1125_v51  ;;  %v1131_v57 = vld [vmem:[%s1993_s2 + $0x48] sm:$0xff]  ;;  %v1132_v58 = vld [vmem:[%s1993_s2 + $0x50] sm:$0xff]  ;;  %v1133_v60 = vld [vmem:[%s1993_s2 + $0x58] sm:$0xff]  ;;  %s1555_s9 = sshll.u32 %s1618_s29, 4  ;;  %s1556_s9 = int_to_ptr.vmem [resolvable:$false] %s1555_s9 }
  0x19   : > { %v290_v10 = vld [vmem:[%s276_s15] sm:$0xff]  ;;  %v291_v13 = vld [vmem:[%s276_s15 + $0x8] sm:$0xff]  ;;  %1398 = vmatpush3.bf16.msra.mxu0 %v1395_v9  ;;  %v1435_v59 = vpack.c.bf16 %v1132_v58, %v1131_v57  ;;  %v1136_v0 = vld [vmem:[%s1993_s2 + $0x70] sm:$0xff]  ;;  %s1557_s13 = scalar_lea.vmem %s1556_s9, 512 }
  0x1a   : > { %294 = vrot.lane.b32.xlu0 %v290_v10, %s1616_s20  ;;  %1400 = vmatprep.subr.bf16.mxu0 %v1399_v14  ;;  %v1134_v61 = vld [vmem:[%s1993_s2 + $0x60] sm:$0xff]  ;;  %v1135_v63 = vld [vmem:[%s1993_s2 + $0x68] sm:$0xff]  ;;  %v1137_v4 = vld [vmem:[%s1993_s2 + $0x78] sm:$0xff] }
  0x1b   : > { %1436 = vmatprep.subr.bf16.mxu1 %v1435_v59  ;;  %v1439_v62 = vpack.c.bf16 %v1134_v61, %v1133_v60  ;;  %v1443_v1 = vpack.c.bf16 %v1136_v0, %v1135_v63  ;;  %v1130_v2 = vld [vmem:[%s1995_s4] ss:$0 sm:$0xff]  ;;  %v1139_v10 = vld [vmem:[%s1993_s2 + $0x88] sm:$0xff]  ;;  %v917_v22 = vld [vmem:[%s1994_s3 + $0x18] sm:$0xff] }
  0x1c   : > { %1438 = vmatpush3.bf16.msra.mxu1 %v1435_v59  ;;  %v1138_v5 = vld [vmem:[%s1993_s2 + $0x80] sm:$0xff]  ;;  %v624_v40 = vld [vmem:[%s1993_s2 + $0x30] sm:$0xff]  ;;  %v625_v41 = vld [vmem:[%s1993_s2 + $0x38] sm:$0xff] }
  0x1d   : > { %1402 = vmatpush3.bf16.msra.mxu0 %v1399_v14  ;;  %1440 = vmatprep.subr.bf16.mxu1 %v1439_v62  ;;  %v1447_v7 = vpack.c.bf16 %v1138_v5, %v1137_v4  ;;  %v618_v14 = vld [vmem:[%s1993_s2] sm:$0xff]  ;;  %v1463_v42 = vpack.c.bf16 %v625_v41, %v624_v40  ;;  %v1147_v47 = vld [vmem:[%s1993_s2 + $0xa8] sm:$0xff]  ;;  %v1148_v52 = vld [vmem:[%s1993_s2 + $0xb0] sm:$0xff] }
  0x1e   : > { %296 = vrot.lane.b32.xlu0 %v291_v13, %s1616_s20  ;;  %1258 = vmatprep.subr.mxu0 %v1114_v15  ;;  %v1151_v57 = vld [vmem:[%s1993_s2 + $0xc8] sm:$0xff]  ;;  %v1152_v59 = vld [vmem:[%s1993_s2 + $0xd0] sm:$0xff]  ;;  %v1155_v4 = vld [vmem:[%s1996_s5] ss:$0 sm:$0xff] }
  0x1f   : > { %v919_v63 = vld [vmem:[%s1994_s3 + $0x28] sm:$0xff] }
  0x20   : > { %1442 = vmatpush3.bf16.msra.mxu1 %v1439_v62  ;;  %v918_v62 = vld [vmem:[%s1994_s3 + $0x20] sm:$0xff] }
  0x21   : > { %1259 = vmatpush3.msra.mxu0 %v1114_v15  ;;  %1444 = vmatprep.subr.bf16.mxu1 %v1443_v1  ;;  %v619_v15 = vld [vmem:[%s1993_s2 + $0x8] sm:$0xff]  ;;  %v1491_v0 = vpack.c.bf16 %v919_v63, %v918_v62 }
  0x22   : > { %1404 = vmatprep.subr.bf16.mxu0 %v1403_v18  ;;  %v1451_v16 = vpack.c.bf16 %v619_v15, %v618_v14  ;;  %v1158_v15 = vld [vmem:[%s1997_s6] ss:$0 sm:$0xff] }
  0x24   : > { %1446 = vmatpush3.bf16.msra.mxu1 %v1443_v1  ;;  %v920_v1 = vld [vmem:[%s1994_s3 + $0x30] sm:$0xff] }
  0x25   : > { %1448 = vmatprep.subr.bf16.mxu1 %v1447_v7 }
  0x28   : > { %1450 = vmatpush3.bf16.msra.mxu1 %v1447_v7 }
  0x29   : > { %1321 = vmatprep.subr.mxu1 %v1139_v10 }
  0x2c   : > { %1322 = vmatpush3.msra.mxu1 %v1139_v10 }
  0x2d   : > { %1452 = vmatprep.subr.bf16.mxu1 %v1451_v16 }
  0x8c   : > { %v295_v19 = vpop.permute.xlu0 %294 }
  0x8d   : > { %301 = vst.msk [vmem:[#allocation2 + $0x1] sm:$0xff] %vm300_vm5, %v295_v19  ;;  %v915_v19 = vld [vmem:[%s1994_s3 + $0x8] sm:$0xff] }
  0x90   : > { %v297_v20 = vpop.permute.xlu0 %296 }
  0x91   : > { %302 = vst.msk [vmem:[#allocation2 + $0x9] sm:$0xff] %vm300_vm5, %v297_v20  ;;  %v916_v20 = vld [vmem:[%s1994_s3 + $0x10] sm:$0xff] }
  0x94   : > { %v303_v21 = vld [vmem:[#allocation2] sm:$0xff] }
  0x95   : > { %v329_v26 = vrot.slane %v303_v21, 1  ;;  %v504_v45 = vrot.slane %v303_v21, 2 }
  0x98   : > { %v304_v23 = vld [vmem:[#allocation2 + $0x8] sm:$0xff]  ;;  %v305_v24 = vld [vmem:[#allocation2 + $0x10] sm:$0x3] }
  0x99   : > { %v330_v27 = vrot.slane %v304_v23, 1  ;;  %v332_v28 = vrot.slane %v305_v24, 1  ;;  %v505_v44 = vrot.slane %v304_v23, 2  ;;  %v507_v55 = vrot.slane %v305_v24, 2 }
  0x9b   : > { %v331_v29 = vsel %vm328_vm6, %v329_v26, %v330_v27  ;;  %v333_v30 = vsel %vm328_vm6, %v330_v27, %v332_v28  ;;  %v506_v49 = vsel %vm503_vm8, %v504_v45, %v505_v44  ;;  %v508_v56 = vsel %vm503_vm8, %v505_v44, %v507_v55  ;;  %v620_v27 = vld [vmem:[%s1993_s2 + $0x10] sm:$0xff]  ;;  %v1145_v45 = vld [vmem:[%s1993_s2 + $0x98] sm:$0xff] }
  0x9c   : > { %1260 = vmatprep.mubr.msk.f32.mxu0 %vm334_vm7, %v331_v29  ;;  %v1144_v44 = vld [vmem:[%s1993_s2 + $0x90] sm:$0xff] }
  0x9d   : > { %1261 = vmatmul.mubr.msk.f32.vlgmr.msra.gmra.mrb[0].mxu0 %vm334_vm7, %v333_v30  ;;  %v621_v30 = vld [vmem:[%s1993_s2 + $0x18] sm:$0xff]  ;;  %v1467_v48 = vpack.c.bf16 %v1145_v45, %v1144_v44 }
  0x9e   : > { %1406 = vmatpush3.bf16.msra.mxu0 %v1403_v18  ;;  %1281 = vmatprep.mubr.msk.f32.mxu0 %vm334_vm7, %v303_v21  ;;  %v914_v18 = vld [vmem:[%s1994_s3] sm:$0xff]  ;;  %v1455_v36 = vpack.c.bf16 %v621_v30, %v620_v27 }
  0x9f   : > { %1408 = vmatprep.subr.bf16.mxu0 %v1407_v31  ;;  %v1483_v21 = vpack.c.bf16 %v915_v19, %v914_v18 }
  0xa2   : > { %1410 = vmatpush3.bf16.msra.mxu0 %v1407_v31 }
  0xa3   : > { %1412 = vmatprep.subr.bf16.mxu0 %v1411_v34 }
  0xa6   : > { %1414 = vmatpush3.bf16.msra.mxu0 %v1411_v34 }
  0xa7   : > { %1416 = vmatprep.subr.bf16.mxu0 %v1415_v37 }
  0xaa   : > { %1418 = vmatpush3.bf16.msra.mxu0 %v1415_v37  ;;  %v622_v37 = vld [vmem:[%s1993_s2 + $0x20] sm:$0xff] }
  0xab   : > { %1279 = vmatprep.subr.mxu0 %v314_v38 }
  0xae   : > { %1280 = vmatpush3.msra.mxu0 %v314_v38  ;;  %v623_v38 = vld [vmem:[%s1993_s2 + $0x28] sm:$0xff] }
  0xaf   : > { %1282 = vmatmul.mubr.msk.f32.vlgmr.msra.gmra.mrb[0].mxu0 %vm334_vm7, %v304_v23  ;;  %1420 = vmatprep.subr.bf16.mxu0 %v1419_v43  ;;  %v1487_v23 = vpack.c.bf16 %v917_v22, %v916_v20  ;;  %v1459_v39 = vpack.c.bf16 %v623_v38, %v622_v37 }
  0xb0   : > { %1422 = vmatpush3.bf16.msra.mxu0 %v1419_v43  ;;  %1302 = vmatprep.mubr.msk.f32.mxu0 %vm334_vm7, %v506_v49  ;;  %v626_v43 = vld [vmem:[%s1993_s2 + $0x40] sm:$0xff] }
  0xb1   : > { %1424 = vmatprep.subr.bf16.mxu0 %v1423_v46 }
  0xb4   : > { %1426 = vmatpush3.bf16.msra.mxu0 %v1423_v46  ;;  %v1146_v46 = vld [vmem:[%s1993_s2 + $0xa0] sm:$0xff] }
  0xb5   : > { %1428 = vmatprep.subr.bf16.mxu0 %v1427_v50  ;;  %v1471_v51 = vpack.c.bf16 %v1147_v47, %v1146_v46 }
  0xb8   : > { %1430 = vmatpush3.bf16.msra.mxu0 %v1427_v50 }
  0xb9   : > { %1432 = vmatprep.subr.bf16.mxu0 %v1431_v53 }
  0xbc   : > { %1434 = vmatpush3.bf16.msra.mxu0 %v1431_v53  ;;  %v1149_v53 = vld [vmem:[%s1993_s2 + $0xb8] sm:$0xff] }
  0xbd   : > { %1300 = vmatprep.subr.mxu0 %v1127_v54  ;;  %v1475_v55 = vpack.c.bf16 %v1149_v53, %v1148_v52 }
  0xc0   : > { %1301 = vmatpush3.msra.mxu0 %v1127_v54 }
  0xc1   : > { %1303 = vmatmul.mubr.msk.f32.vlgmr.msra.gmra.mrb[0].mxu0 %vm334_vm7, %v508_v56  ;;  %1484 = vmatprep.subr.bf16.mxu0 %v1483_v21  ;;  %v1150_v56 = vld [vmem:[%s1993_s2 + $0xc0] sm:$0xff] }
  0xc2   : > { %1486 = vmatpush3.bf16.msra.mxu0 %v1483_v21  ;;  %v1479_v58 = vpack.c.bf16 %v1151_v57, %v1150_v56 }
  0xc3   : > { %1488 = vmatprep.subr.bf16.mxu0 %v1487_v23 }
  0xc6   : > { %1490 = vmatpush3.bf16.msra.mxu0 %v1487_v23 }
  0xc7   : > { %1492 = vmatprep.subr.bf16.mxu0 %v1491_v0 }
  0xca   : > { %1494 = vmatpush3.bf16.msra.mxu0 %v1491_v0 }
 0x194   : > { %v1304_v3 = vpop.f32.mrb[0].mxu0 }
 0x195   : > { %v579_v6 = vpop.f32.mrb[1].mxu0  ;;  %v598_v8 = vadd.f32 %v1304_v3, %v1130_v2 }
 0x196   : > { %v597_v9 = vadd.f32 %v1130_v2, %v579_v6  ;;  %924 = vrot.lane.b32.xlu0 %v579_v6, %s1617_s8  ;;  %v921_v2 = vld [vmem:[%s1994_s3 + $0x38] sm:$0xff] }
 0x197   : > { %v602_v13 = vmul.f32 0.1, %v598_v8  ;;  %vm600_vm10 = vcmp.gt.f32.partialorder %v598_v8, 0.0 }
 0x198   : > { %vm599_vm9 = vcmp.gt.f32.partialorder %v597_v9, 0.0  ;;  %v601_v11 = vmul.f32 0.1, %v597_v9 }
 0x199   : > { %v604_v17 = vsel %vm600_vm10, %v598_v8, %v602_v13 }
 0x19a   : > { %v603_v12 = vsel %vm599_vm9, %v597_v9, %v601_v11 }
 0x19b   : > { %607 = vrot.lane.b32.xlu1 %v603_v12, %s1616_s20 }
 0x19f   : > { %609 = vrot.lane.b32.xlu1 %v604_v17, %s1616_s20  ;;  %s269_s20 = sand.u32 1, %s1605_s25  }
 0x1a0   : > { %s1950_s28 = scalar_lea.sflag [#allocation4], %s269_s20 }
 0x1a3   : > { %926 = vrot.lane.b32.xlu1 %v1304_v3, %s1617_s8  ;;  %v1495_v3 = vpack.c.bf16 %v921_v2, %v920_v1  ;;  %s1103_s8 = sshll.u32 %s269_s20, 4 }
 0x1a4   : > { %s271_s16 = scalar_lea.vmem [#allocation3], %s1103_s8 }
 0x1a5   : > { %1496 = vmatprep.subr.bf16.mxu0 %v1495_v3  ;;  %s1037_s17 = sshll.u32 %s271_s16, 4  ;;  %s1946_s17 = int_to_ptr.vmem [resolvable:$true] %s1037_s17 }
 0x1a6   : > { %1498 = vmatpush3.bf16.msra.mxu0 %v1495_v3  ;;  %s1551_s23 = scalar_lea.vmem %s1946_s17, 256  ;;  %p1558_p0 = scmp.lt.s32.totalorder %s1946_s17, %s1556_s9 }
 0x1a7   : > { %p1552_p11 = scmp.ne.s32.totalorder %s1946_s17, %s1551_s23  ;;  %p1559_p1 = scmp.lt.s32.totalorder %s1557_s13, %s1551_s23 }
 0x1a9   : > { %p1553_p12 = pnand %p1552_p11, %p1699_p5  ;;  %p1560_p2 = por %p1559_p1, %p1558_p0 }
 0x1ab   : > { %p1554_p13 = pneg %p1553_p12 }
 0x1ad   : > { %p1561_p3 = pnand %p1560_p2, %p1554_p13 }
 0x20d   : > { %v608_v24 = vpop.permute.xlu1 %607 }
 0x20e   : > { %613 = vst.msk [vmem:[#allocation2 + $0x1] sm:$0xff] %vm300_vm5, %v608_v24 }
 0x211   : > { %v610_v25 = vpop.permute.xlu1 %609 }
 0x212   : > { %614 = vst.msk [vmem:[#allocation2 + $0x9] sm:$0xff] %vm300_vm5, %v610_v25 }
 0x215   : > { %v615_v26 = vld [vmem:[#allocation2] sm:$0xff]  ;;  %v927_v13 = vpop.permute.xlu1 %926 }
 0x216   : > { %v640_v31 = vrot.slane %v615_v26, 1  ;;  %v813_v50 = vrot.slane %v615_v26, 2 }
 0x219   : > { %v616_v28 = vld [vmem:[#allocation2 + $0x8] sm:$0xff]  ;;  %v617_v29 = vld [vmem:[#allocation2 + $0x10] sm:$0x3] }
 0x21a   : > { %v641_v32 = vrot.slane %v616_v28, 1  ;;  %v643_v33 = vrot.slane %v617_v29, 1  ;;  %v814_v49 = vrot.slane %v616_v28, 2  ;;  %v816_v60 = vrot.slane %v617_v29, 2 }
 0x21c   : > { %v642_v34 = vsel %vm328_vm6, %v640_v31, %v641_v32  ;;  %v644_v35 = vsel %vm328_vm6, %v641_v32, %v643_v33  ;;  %v815_v54 = vsel %vm503_vm8, %v813_v50, %v814_v49  ;;  %v817_v61 = vsel %vm503_vm8, %v814_v49, %v816_v60 }
 0x21d   : > { %1323 = vmatprep.mubr.msk.f32.mxu1 %vm334_vm7, %v642_v34 }
 0x21e   : > { %1324 = vmatmul.mubr.msk.f32.vlgmr.msra.gmra.mrb[0].mxu1 %vm334_vm7, %v644_v35 }
 0x21f   : > { %1454 = vmatpush3.bf16.msra.mxu1 %v1451_v16  ;;  %1344 = vmatprep.mubr.msk.f32.mxu1 %vm334_vm7, %v615_v26  ;;  %v925_v16 = vpop.permute.xlu0 %924 }
 0x220   : > { %1456 = vmatprep.subr.bf16.mxu1 %v1455_v36 }
 0x223   : > { %1458 = vmatpush3.bf16.msra.mxu1 %v1455_v36 }
 0x224   : > { %1460 = vmatprep.subr.bf16.mxu1 %v1459_v39 }
 0x227   : > { %1462 = vmatpush3.bf16.msra.mxu1 %v1459_v39 }
 0x228   : > { %1464 = vmatprep.subr.bf16.mxu1 %v1463_v42 }
 0x22b   : > { %1466 = vmatpush3.bf16.msra.mxu1 %v1463_v42 }
 0x22c   : > { %1342 = vmatprep.subr.mxu1 %v626_v43 }
 0x22f   : > { %1343 = vmatpush3.msra.mxu1 %v626_v43 }
 0x230   : > { %1345 = vmatmul.mubr.msk.f32.vlgmr.msra.gmra.mrb[0].mxu1 %vm334_vm7, %v616_v28  ;;  %1468 = vmatprep.subr.bf16.mxu1 %v1467_v48 }
 0x231   : > { %1470 = vmatpush3.bf16.msra.mxu1 %v1467_v48  ;;  %1365 = vmatprep.mubr.msk.f32.mxu1 %vm334_vm7, %v815_v54 }
 0x232   : > { %1472 = vmatprep.subr.bf16.mxu1 %v1471_v51 }
 0x235   : > { %1474 = vmatpush3.bf16.msra.mxu1 %v1471_v51 }
 0x236   : > { %1476 = vmatprep.subr.bf16.mxu1 %v1475_v55 }
 0x239   : > { %1478 = vmatpush3.bf16.msra.mxu1 %v1475_v55 }
 0x23a   : > { %1480 = vmatprep.subr.bf16.mxu1 %v1479_v58 }
 0x23d   : > { %1482 = vmatpush3.bf16.msra.mxu1 %v1479_v58 }
 0x23e   : > { %1363 = vmatprep.subr.mxu1 %v1152_v59 }
 0x241   : > { %1364 = vmatpush3.msra.mxu1 %v1152_v59 }
 0x242   : > { %1366 = vmatmul.mubr.msk.f32.vlgmr.msra.gmra.mrb[0].mxu1 %vm334_vm7, %v817_v61 }
 0x315   : > { %v1367_v5 = vpop.f32.mrb[0].mxu1 }
 0x316   : > { %v907_v6 = vadd.f32 %v1367_v5, %v1155_v4  ;;  %v888_v7 = vpop.f32.mrb[1].mxu1 }
 0x317   : > { %v906_v8 = vadd.f32 %v1155_v4, %v888_v7 }
 0x318   : > { %v911_v9 = vmul.f32 0.1, %v907_v6  ;;  %vm909_vm11 = vcmp.gt.f32.partialorder %v907_v6, 0.0 }
 0x319   : > { %vm908_vm12 = vcmp.gt.f32.partialorder %v906_v8, 0.0  ;;  %v910_v10 = vmul.f32 0.1, %v906_v8 }
 0x31a   : > { %v913_v12 = vsel %vm909_vm11, %v907_v6, %v911_v9 }
 0x31b   : > { %v912_v11 = vsel %vm908_vm12, %v906_v8, %v910_v10 }
 0x31c   : > { %1384 = vmatprep.mubr.msk.f32.mxu0 %vm930_vm13, %v912_v11 }
 0x31d   : > { %1385 = vmatmul.mubr.msk.f32.vlgmr.msra.gmra.mrb[2].mxu0 %vm930_vm13, %v913_v12 }
 0x3f0   : > { %v1386_v14 = vpop.f32.mrb[2].mxu0 }
 0x3f1   : > { %v1009_v17 = vadd.f32 %v1386_v14, %v927_v13  ;;  %v1003_v18 = vpop.f32.mrb[3].mxu0 }
 0x3f2   : > { %v1004_v19 = vadd.f32 %v1003_v18, %v925_v16 }
 0x3f3   : > { %v1020_v20 = vadd.f32 %v1158_v15, %v1009_v17 }
 0x3f4   : > { %v1019_v21 = vadd.f32 %v1158_v15, %v1004_v19 }
 0x3f5   : > { %1022 = vst.msk [vmem:[%s271_s16 + $0x8] sm:$0xff] %vm930_vm13, %v1020_v20 }
 0x3f6   : > { %1021 = vst.msk [vmem:[%s271_s16] sm:$0xff] %vm930_vm13, %v1019_v21 }
 0x3f7   : > { %1564 = shalt.err (!%p1561_p3)
}
 0x3f8   : > { %s1565_s20 = scalar_lea.hbm %s1944_s22, 256  ;;  %s1569_s15 = scalar_lea.hbm %s1998_s7, 512 }
 0x3f9   : > { %p1566_p4 = scmp.ne.s32.totalorder %s1944_s22, %s1565_s20  ;;  %p1570_p9 = scmp.lt.u32.totalorder %s1944_s22, %s1998_s7 }
 0x3fa   : > { %p1571_p10 = scmp.lt.u32.totalorder %s1569_s15, %s1565_s20  ;;  %p1573_p12 = scmp.lt.u32.totalorder %s1565_s20, %s1944_s22 }
 0x3fb   : > { %p1567_p7 = pnand %p1566_p4, %p1699_p5 }
 0x3fc   : > { %p1572_p11 = por %p1571_p10, %p1570_p9 }
 0x3fd   : > { %p1568_p8 = pneg %p1567_p7 }
 0x3fe   : > { %p1574_p13 = por %p1573_p12, %p1572_p11 }
 0x400   : > { %p1575_p0 = pnand %p1574_p13, %p1568_p8 }
 0x402   : > { %1578 = shalt.err (!%p1575_p0)
}
 0x403   : > { %s1619_s19 = smov 128   ;;  %s1620_s21 = smov 8  }
 0x404   : > { %1507 = dma.vmem_to_hbm [thread:$0]  (%p1699_p5), %s1946_s17, 256, %s1944_s22, %s1950_s28, %s1619_s19, %s1619_s19, %s1620_s21  }
 0x405 PF: > { %p1513_p1 = scmp.ge.s32.totalorder %s1613_s27, 2  ;;  %s1052_s23 = sand.u32 1, %s1601_s24  }
 0x406   : > { %s1053_s29 = scalar_lea.sflag [#allocation4], %s1052_s23 }
 0x407   : > { %p1510_p2 = pnand %p1513_p1, %p1703_p6 }
 0x409   : > { %1596 = dma.done.wait (!%p1510_p2), %s1053_s29, 256  }
 0x40a   : > { %1598 = vsyncadd (!%p1510_p2), %s1053_s29, 4294967040  ;;  %p17_p3 = scmp.ge.s32.totalorder %s1686_s30, 4   ;;  %s2001_s24 = smov %s1605_s25 }
 0x40b   : > { %s2002_s25 = smov %s1609_s26  ;;  %s2003_s26 = smov %s1697_s10 }
 0x40c   : > { %s2004_s27 = smov %s1686_s30  ;;  %19 = sbr.rel (!%p17_p3) target bundleno = 3 (0x3), region = 87 }
 0x413   :  { %1058 = vsyncpa [#allocation4], 1 }
 0x414   :  { %1060 = vsyncpa [#allocation4 + $0x1], 1 }

</bundles_post_ra>
